<compile_context>
chip_gen: v5e
topology: v5e:2x2
jax: 0.10.0
libtpu: 0.0.40
codegen_flags: <defaults>
</compile_context>

<pallas_src>
import jax
import jax.numpy as jnp
from jax.experimental import pallas as pl
from jax.experimental.pallas import tpu as pltpu

STATE_SIZE = 1
HIDDEN = 156
ACTION_SIZE = 100

H_PAD = 256      # 156 -> 2 full 128-lane tiles; clean MXU K dim, no masked tail
N_PAD = 128      # 100 -> full 128-lane width (lane-dense stores)
NEG_BIG = -1e30  # padded-logit bias so exp() of padded actions is 0
TB_MAX = 1024    # max batch-tile rows per grid step


def _round_up(n, m):
    return ((n + m - 1) // m) * m


def policy_kernel(x_ref, w1_ref, b1_ref, w2_ref, b2_ref, out_ref):
    # x: [TB, 1]
    x = x_ref[...]

    # affine1 with K=1: pure VPU broadcast/outer-product, no MXU round-trip.
    # [TB, 1] * [1, H_PAD] + [1, H_PAD] -> [TB, H_PAD]
    # dropout (eval mode -> identity), then ReLU.
    h = jnp.maximum(x * w1_ref[...] + b1_ref[...], 0.0)

    # affine2 on the MXU: [TB, H_PAD] @ [H_PAD, N_PAD] + [1, N_PAD]
    logits = jnp.dot(h, w2_ref[...], preferred_element_type=jnp.float32) + b2_ref[...]

    # numerically-stable softmax over the lane axis (padded lanes carry -1e30
    # bias so they contribute ~0 to the denominator).
    m = jnp.max(logits, axis=1, keepdims=True)
    e = jnp.exp(logits - m)
    denom = jnp.sum(e, axis=1, keepdims=True)

    # EUP approximate reciprocal + one Newton refinement step (cheap [TB,1] VPU
    # ops) keeps accuracy well under 1e-5 while avoiding a full fp32 divide.
    r = pl.reciprocal(denom, approx=True)
    r = r * (2.0 - denom * r)

    out_ref[...] = (e * r).astype(out_ref.dtype)


def pad_params(w1, b1, w2, b2):
    """One-time padding of params to hardware-friendly shapes (do NOT call per step).

    Padded hidden units get zero w1/b1/w2 (exact no-op through ReLU and the
    matmul); padded action lanes get a -1e30 bias so softmax ignores them.
    """
    w1_p = jnp.pad(w1.astype(jnp.float32), ((0, 0), (0, H_PAD - HIDDEN)))
    b1_p = jnp.pad(b1.astype(jnp.float32), ((0, 0), (0, H_PAD - HIDDEN)))
    w2_p = jnp.pad(w2.astype(jnp.float32),
                   ((0, H_PAD - HIDDEN), (0, N_PAD - ACTION_SIZE)))
    b2_p = jnp.pad(b2.astype(jnp.float32), ((0, 0), (0, N_PAD - ACTION_SIZE)),
                   constant_values=NEG_BIG)
    return w1_p, b1_p, w2_p, b2_p


@jax.jit
def policy_forward(x, w1_p, b1_p, w2_p, b2_p):
    """x: [B, STATE_SIZE]; params already padded by pad_params (done once at init)."""
    B = x.shape[0]
    tb = min(TB_MAX, _round_up(B, 8))      # batch-tile rows (sublane-aligned)
    B_pad = _round_up(B, tb)

    # Single pad op for the activations (padded rows are sliced off below).
    x_p = jnp.pad(x.astype(jnp.float32), ((0, B_pad - B), (0, 0)))

    out_p = pl.pallas_call(
        policy_kernel,
        out_shape=jax.ShapeDtypeStruct((B_pad, N_PAD), jnp.float32),
        grid=(B_pad // tb,),
        in_specs=[
            pl.BlockSpec((tb, STATE_SIZE), lambda i: (i, 0)),     # x: tiled over batch
            pl.BlockSpec((STATE_SIZE, H_PAD), lambda i: (0, 0)),  # params: resident,
            pl.BlockSpec((1, H_PAD), lambda i: (0, 0)),           # constant block ->
            pl.BlockSpec((H_PAD, N_PAD), lambda i: (0, 0)),       # DMA'd once, not
            pl.BlockSpec((1, N_PAD), lambda i: (0, 0)),           # per grid step
        ],
        out_specs=pl.BlockSpec((tb, N_PAD), lambda i: (i, 0)),
        compiler_params=pltpu.CompilerParams(
            # Batch tiles are independent: lets v7x's two TensorCores split the
            # rollout batch (no-op on single-TC v5e/v6e).
            dimension_semantics=("parallel",),
        ),
    )(x_p, w1_p, b1_p, w2_p, b2_p)

    # NOTE: padded batch rows hold garbage softmax rows; this slice removes them.
    return out_p[:B, :ACTION_SIZE]


def init_params(key):
    # Deterministic init mimicking PyTorch Linear's U(-1/sqrt(fan_in), 1/sqrt(fan_in)).
    k1, k2, k3, k4 = jax.random.split(key, 4)
    bound1 = 1.0 / jnp.sqrt(jnp.float32(STATE_SIZE))
    bound2 = 1.0 / jnp.sqrt(jnp.float32(HIDDEN))
    # Stored pre-transposed: [in, out]
    w1 = jax.random.uniform(k1, (STATE_SIZE, HIDDEN), jnp.float32, -bound1, bound1)
    b1 = jax.random.uniform(k2, (1, HIDDEN), jnp.float32, -bound1, bound1)
    w2 = jax.random.uniform(k3, (HIDDEN, ACTION_SIZE), jnp.float32, -bound2, bound2)
    b2 = jax.random.uniform(k4, (1, ACTION_SIZE), jnp.float32, -bound2, bound2)
    return w1, b1, w2, b2


def reference_forward(x, w1, b1, w2, b2):
    h = jnp.maximum(x @ w1 + b1, 0.0)
    logits = h @ w2 + b2
    return jax.nn.softmax(logits, axis=1)


if __name__ == "__main__":
    key = jax.random.PRNGKey(0)
    pkey, xkey1, xkey2 = jax.random.split(key, 3)
    w1, b1, w2, b2 = init_params(pkey)
    padded = pad_params(w1, b1, w2, b2)   # one-time padding, hoisted out of forward

    # Small bandit-style batch (single grid step).
    B = 4
    x = jax.random.normal(xkey1, (B, STATE_SIZE), jnp.float32)
    out = jax.block_until_ready(policy_forward(x, *padded))
    ref = reference_forward(x, w1, b1, w2, b2)
    assert out.shape == (B, ACTION_SIZE)
    assert jnp.allclose(out, ref, atol=1e-5, rtol=1e-5)
    assert jnp.allclose(jnp.sum(out, axis=1), jnp.ones((B,)), atol=1e-5)

    # Larger rollout batch to exercise the 1-D "parallel" batch grid (2 steps).
    B2 = 1300
    x2 = jax.random.normal(xkey2, (B2, STATE_SIZE), jnp.float32)
    out2 = jax.block_until_ready(policy_forward(x2, *padded))
    ref2 = reference_forward(x2, w1, b1, w2, b2)
    assert out2.shape == (B2, ACTION_SIZE)
    assert jnp.allclose(out2, ref2, atol=1e-5, rtol=1e-5)
    assert jnp.allclose(jnp.sum(out2, axis=1), jnp.ones((B2,)), atol=1e-5)

    print("KERNEL_OK")
</pallas_src>

<mosaic_0001>
module attributes {stable_mosaic.version = 11 : i64} {
  func.func @policy_kernel(%arg0: i32, %arg1: memref<8x1xf32, #tpu.memory_space<vmem>>, %arg2: memref<1x256xf32, #tpu.memory_space<vmem>>, %arg3: memref<1x256xf32, #tpu.memory_space<vmem>>, %arg4: memref<256x128xf32, #tpu.memory_space<vmem>>, %arg5: memref<1x128xf32, #tpu.memory_space<vmem>>, %arg6: memref<8x128xf32, #tpu.memory_space<vmem>>) attributes {dimension_semantics = [#tpu.dimension_semantics<parallel>], iteration_bounds = array<i64: 1>, scalar_prefetch = 0 : i64, scratch_operands = 0 : i64, tpu.core_type = #tpu.core_type<tc>, window_params = [{transform_indices = @transform_0, window_bounds = array<i64: 8, 1>}, {pipeline_mode = #tpu.pipeline_mode<synchronous>, transform_indices = @transform_1, window_bounds = array<i64: 1, 256>}, {pipeline_mode = #tpu.pipeline_mode<synchronous>, transform_indices = @transform_2, window_bounds = array<i64: 1, 256>}, {pipeline_mode = #tpu.pipeline_mode<synchronous>, transform_indices = @transform_3, window_bounds = array<i64: 256, 128>}, {pipeline_mode = #tpu.pipeline_mode<synchronous>, transform_indices = @transform_4, window_bounds = array<i64: 1, 128>}, {transform_indices = @transform_5, window_bounds = array<i64: 8, 128>}]} {
    %c0 = arith.constant 0 : index
    %c0_0 = arith.constant 0 : index
    %0 = vector.load %arg1[%c0, %c0_0] : memref<8x1xf32, #tpu.memory_space<vmem>>, vector<8x1xf32>
    %c0_1 = arith.constant 0 : index
    %c0_2 = arith.constant 0 : index
    %1 = vector.load %arg2[%c0_1, %c0_2] : memref<1x256xf32, #tpu.memory_space<vmem>>, vector<1x256xf32>
    %2 = vector.broadcast %0 : vector<8x1xf32> to vector<8x256xf32>
    %3 = vector.broadcast %1 : vector<1x256xf32> to vector<8x256xf32>
    %4 = arith.mulf %2, %3 : vector<8x256xf32>
    %c0_3 = arith.constant 0 : index
    %c0_4 = arith.constant 0 : index
    %5 = vector.load %arg3[%c0_3, %c0_4] : memref<1x256xf32, #tpu.memory_space<vmem>>, vector<1x256xf32>
    %6 = vector.broadcast %5 : vector<1x256xf32> to vector<8x256xf32>
    %7 = arith.addf %4, %6 : vector<8x256xf32>
    %cst = arith.constant 0.000000e+00 : f32
    %8 = vector.broadcast %cst : f32 to vector<8x256xf32>
    %9 = arith.maximumf %7, %8 : vector<8x256xf32>
    %c0_5 = arith.constant 0 : index
    %c0_6 = arith.constant 0 : index
    %10 = vector.load %arg4[%c0_5, %c0_6] : memref<256x128xf32, #tpu.memory_space<vmem>>, vector<256x128xf32>
    %cst_7 = arith.constant dense<0.000000e+00> : vector<8x128xf32>
    %11 = tpu.matmul %9, %10, %cst_7 {dimension_numbers = #tpu.dot_dimension_numbers<[1], [0], [0], [1], [0, 0, 1, 1], [], []>} : vector<8x256xf32>, vector<256x128xf32>, vector<8x128xf32> -> vector<8x128xf32>
    %c0_8 = arith.constant 0 : index
    %c0_9 = arith.constant 0 : index
    %12 = vector.load %arg5[%c0_8, %c0_9] : memref<1x128xf32, #tpu.memory_space<vmem>>, vector<1x128xf32>
    %13 = vector.broadcast %12 : vector<1x128xf32> to vector<8x128xf32>
    %14 = arith.addf %11, %13 : vector<8x128xf32>
    %cst_10 = arith.constant dense<0xFF800000> : vector<8xf32>
    %15 = vector.multi_reduction <maximumf>, %14, %cst_10 [1] : vector<8x128xf32> to vector<8xf32>
    %16 = vector.shape_cast %15 : vector<8xf32> to vector<8x1xf32>
    %17 = vector.broadcast %16 : vector<8x1xf32> to vector<8x128xf32>
    %18 = arith.subf %14, %17 : vector<8x128xf32>
    %19 = math.exp %18 : vector<8x128xf32>
    %cst_11 = arith.constant dense<0.000000e+00> : vector<8xf32>
    %20 = vector.multi_reduction <add>, %19, %cst_11 [1] : vector<8x128xf32> to vector<8xf32>
    %21 = vector.shape_cast %20 : vector<8xf32> to vector<8x1xf32>
    %22 = tpu.reciprocal %21 {approx = true} : vector<8x1xf32> -> vector<8x1xf32>
    %23 = arith.mulf %21, %22 : vector<8x1xf32>
    %cst_12 = arith.constant 2.000000e+00 : f32
    %24 = vector.broadcast %cst_12 : f32 to vector<8x1xf32>
    %25 = arith.subf %24, %23 : vector<8x1xf32>
    %26 = arith.mulf %22, %25 : vector<8x1xf32>
    %27 = vector.broadcast %26 : vector<8x1xf32> to vector<8x128xf32>
    %28 = arith.mulf %19, %27 : vector<8x128xf32>
    %c0_13 = arith.constant 0 : index
    %c0_14 = arith.constant 0 : index
    %29 = vector.load %arg6[%c0_13, %c0_14] : memref<8x128xf32, #tpu.memory_space<vmem>>, vector<8x128xf32>
    tpu.vector_store %arg6[%c0_13, %c0_14], %28 {strides = array<i32>} : memref<8x128xf32, #tpu.memory_space<vmem>>, vector<8x128xf32>,
    return
  }
  func.func @transform_0(%arg0: i32) -> (i32, i32) {
    %c0_i32 = arith.constant 0 : i32
    %c0_i32_0 = arith.constant 0 : i32
    return %arg0, %c0_i32 : i32, i32
  }
  func.func @transform_1(%arg0: i32) -> (i32, i32) {
    %c0_i32 = arith.constant 0 : i32
    %c0_i32_0 = arith.constant 0 : i32
    %c0_i32_1 = arith.constant 0 : i32
    return %c0_i32, %c0_i32_0 : i32, i32
  }
  func.func @transform_2(%arg0: i32) -> (i32, i32) {
    %c0_i32 = arith.constant 0 : i32
    %c0_i32_0 = arith.constant 0 : i32
    %c0_i32_1 = arith.constant 0 : i32
    return %c0_i32, %c0_i32_0 : i32, i32
  }
  func.func @transform_3(%arg0: i32) -> (i32, i32) {
    %c0_i32 = arith.constant 0 : i32
    %c0_i32_0 = arith.constant 0 : i32
    %c0_i32_1 = arith.constant 0 : i32
    return %c0_i32, %c0_i32_0 : i32, i32
  }
  func.func @transform_4(%arg0: i32) -> (i32, i32) {
    %c0_i32 = arith.constant 0 : i32
    %c0_i32_0 = arith.constant 0 : i32
    %c0_i32_1 = arith.constant 0 : i32
    return %c0_i32, %c0_i32_0 : i32, i32
  }
  func.func @transform_5(%arg0: i32) -> (i32, i32) {
    %c0_i32 = arith.constant 0 : i32
    %c0_i32_0 = arith.constant 0 : i32
    return %arg0, %c0_i32 : i32, i32
  }
}

</mosaic_0001>

<bundles_post_ra>
// kernel: policy_forward.1
= control target key start
LH: loop header
LB: loop body
LE: loop exit
PB: predicated region body
PF: predicated region fallthrough
CT: control target
= control target key end

     0   :  { %10 = vsyncpa [#allocation3], 0  ;;  %s190_s21 = smov [#allocation2]   ;;  %s191_s23 = smov 128   ;;  %s242_s0 = inlined_call_operand.vmem [shape: f32[8,1], index: 0, kind: input, shape index: {}]   ;;  %s243_s1 = inlined_call_operand.vmem [shape: f32[1,256], index: 1, kind: input, shape index: {}]   ;;  %s244_s2 = inlined_call_operand.vmem [shape: f32[1,256], index: 2, kind: input, shape index: {}]   ;;  %s245_s3 = inlined_call_operand.hbm [shape: f32[256,128], index: 3, kind: input, shape index: {}]   ;;  %s246_s4 = inlined_call_operand.vmem [shape: f32[1,128], index: 4, kind: input, shape index: {}]   ;;  %s247_s5 = inlined_call_operand.vmem [shape: f32[8,128], index: 5, kind: output, shape index: {}]  }
   0x1   :  { %s21_s20 = sshll.u32 %s245_s3, 4  ;;  %s23_s22 = sshll.u32 %s190_s21, 4  ;;  %s22_s20 = int_to_ptr.hbm [resolvable:$true] %s21_s20  ;;  %s24_s22 = int_to_ptr.vmem [resolvable:$true] %s23_s22 }
   0x2   :  { %s192_s24 = smov 8  }
   0x3   :  { %29 = dma.hbm_to_vmem [thread:$0]  %s22_s20, 4096, %s24_s22, [#allocation3], %s191_s23, %s191_s23, %s192_s24  }
   0x4   :  { %188 = dma.done.wait [#allocation3], 4096  }
   0x5   :  { %189 = vsyncadd [#allocation3], 4294963200  ;;  %v193_v0 = vmov 0   ;;  %v36_v1 = vld [vmem:[%s242_s0] sm:$0xff]  ;;  %v75_v2 = vld [vmem:[#allocation2 + $0x78] sm:$0xff] }
   0x6   :  { %158 = vset.pattern.permute.xlu0 %v193_v0  ;;  %v91_v3 = vld [vmem:[#allocation2 + $0xf8] sm:$0xff]  ;;  %96 = vmatpush.msra.mxu0 %v75_v2  ;;  %v74_v4 = vld [vmem:[#allocation2 + $0x70] sm:$0xff]  ;;  %v73_v6 = vld [vmem:[#allocation2 + $0x68] sm:$0xff] }
   0x7   :  { %40 = vperm.xlu0 %158, %v36_v1   ;;  %v90_v5 = vld [vmem:[#allocation2 + $0xf0] sm:$0xff]  ;;  %116 = vmatpush.msra.mxu1 %v91_v3  ;;  %v89_v7 = vld [vmem:[#allocation2 + $0xe8] sm:$0xff]  ;;  %v72_v8 = vld [vmem:[#allocation2 + $0x60] sm:$0xff] }
   0x8   :  { %97 = vmatpush.msra.mxu0 %v74_v4  ;;  %v88_v9 = vld [vmem:[#allocation2 + $0xe0] sm:$0xff]  ;;  %v71_v10 = vld [vmem:[#allocation2 + $0x58] sm:$0xff]  ;;  %v70_v12 = vld [vmem:[#allocation2 + $0x50] sm:$0xff] }
   0x9   :  { %117 = vmatpush.msra.mxu1 %v90_v5  ;;  %v87_v11 = vld [vmem:[#allocation2 + $0xd8] sm:$0xff]  ;;  %v86_v13 = vld [vmem:[#allocation2 + $0xd0] sm:$0xff]  ;;  %v69_v14 = vld [vmem:[#allocation2 + $0x48] sm:$0xff] }
   0xa   :  { %98 = vmatpush.msra.mxu0 %v73_v6  ;;  %v85_v15 = vld [vmem:[#allocation2 + $0xc8] sm:$0xff]  ;;  %v68_v16 = vld [vmem:[#allocation2 + $0x40] sm:$0xff]  ;;  %v67_v18 = vld [vmem:[#allocation2 + $0x38] sm:$0xff] }
   0xb   :  { %118 = vmatpush.msra.mxu1 %v89_v7  ;;  %v84_v17 = vld [vmem:[#allocation2 + $0xc0] sm:$0xff]  ;;  %v83_v19 = vld [vmem:[#allocation2 + $0xb8] sm:$0xff]  ;;  %v66_v20 = vld [vmem:[#allocation2 + $0x30] sm:$0xff] }
   0xc   :  { %99 = vmatpush.msra.mxu0 %v72_v8  ;;  %v82_v21 = vld [vmem:[#allocation2 + $0xb0] sm:$0xff]  ;;  %v65_v22 = vld [vmem:[#allocation2 + $0x28] sm:$0xff]  ;;  %v64_v24 = vld [vmem:[#allocation2 + $0x20] sm:$0xff] }
   0xd   :  { %119 = vmatpush.msra.mxu1 %v88_v9  ;;  %v81_v23 = vld [vmem:[#allocation2 + $0xa8] sm:$0xff]  ;;  %v80_v25 = vld [vmem:[#allocation2 + $0xa0] sm:$0xff]  ;;  %v63_v26 = vld [vmem:[#allocation2 + $0x18] sm:$0xff] }
   0xe   :  { %100 = vmatpush.msra.mxu0 %v71_v10  ;;  %v79_v27 = vld [vmem:[#allocation2 + $0x98] sm:$0xff]  ;;  %v62_v28 = vld [vmem:[#allocation2 + $0x10] sm:$0xff]  ;;  %v61_v30 = vld [vmem:[#allocation2 + $0x8] sm:$0xff] }
   0xf   :  { %120 = vmatpush.msra.mxu1 %v87_v11  ;;  %v78_v29 = vld [vmem:[#allocation2 + $0x90] sm:$0xff]  ;;  %v77_v31 = vld [vmem:[#allocation2 + $0x88] sm:$0xff]  ;;  %v60_v32 = vld [vmem:[#allocation2] sm:$0xff] }
  0x10   :  { %101 = vmatpush.msra.mxu0 %v70_v12  ;;  %v76_v33 = vld [vmem:[#allocation2 + $0x80] sm:$0xff] }
  0x11   :  { %121 = vmatpush.msra.mxu1 %v86_v13  ;;  %v37_v34 = vld [vmem:[%s243_s1] sm:$0x3] }
  0x12   :  { %102 = vmatpush.msra.mxu0 %v69_v14  ;;  %v50_v35 = vld [vmem:[%s244_s2] sm:$0x3]  ;;  %v44_v36 = vperm.slane %v37_v34, 0  ;;  %v45_v37 = vperm.slane %v37_v34, 1 }
  0x13   :  { %122 = vmatpush.msra.mxu1 %v85_v15  ;;  %v52_v38 = vperm.slane %v50_v35, 0  ;;  %v53_v39 = vperm.slane %v50_v35, 1  ;;  %v159_v47 = vld [vmem:[%s246_s4] ss:$0 sm:$0xff] }
  0x14   :  { %103 = vmatpush.msra.mxu0 %v68_v16 }
  0x15   :  { %123 = vmatpush.msra.mxu1 %v84_v17 }
  0x16   :  { %104 = vmatpush.msra.mxu0 %v67_v18 }
  0x17   :  { %124 = vmatpush.msra.mxu1 %v83_v19 }
  0x18   :  { %105 = vmatpush.msra.mxu0 %v66_v20 }
  0x19   :  { %125 = vmatpush.msra.mxu1 %v82_v21 }
  0x1a   :  { %106 = vmatpush.msra.mxu0 %v65_v22 }
  0x1b   :  { %126 = vmatpush.msra.mxu1 %v81_v23 }
  0x1c   :  { %107 = vmatpush.msra.mxu0 %v64_v24 }
  0x1d   :  { %127 = vmatpush.msra.mxu1 %v80_v25 }
  0x1e   :  { %108 = vmatpush.msra.mxu0 %v63_v26 }
  0x1f   :  { %128 = vmatpush.msra.mxu1 %v79_v27 }
  0x20   :  { %109 = vmatpush.msra.mxu0 %v62_v28 }
  0x21   :  { %129 = vmatpush.msra.mxu1 %v78_v29 }
  0x22   :  { %110 = vmatpush.msra.mxu0 %v61_v30 }
  0x23   :  { %130 = vmatpush.msra.mxu1 %v77_v31 }
  0x24   :  { %111 = vmatpush.msra.mxu0 %v60_v32 }
  0x25   :  { %131 = vmatpush.msra.mxu1 %v76_v33 }
  0x79   :  { %v41_v40 = vpop.permute.xlu0 %40 }
  0x7a   :  { %v48_v41 = vmul.f32 %v44_v36, %v41_v40  ;;  %v49_v42 = vmul.f32 %v45_v37, %v41_v40 }
  0x7c   :  { %v56_v43 = vadd.f32 %v52_v38, %v48_v41  ;;  %v57_v44 = vadd.f32 %v53_v39, %v49_v42 }
  0x7e   :  { %v58_v45 = vmax.f32 %v56_v43, 0.0  ;;  %v59_v46 = vmax.f32 %v57_v44, 0.0 }
  0x80   :  { %112 = vmatmul.f32.vlgmr.msra.gmra.mxu0 %v58_v45  ;;  %132 = vmatmul.f32.vlgmr.msra.gmra.mxu1 %v59_v46 }
  0xfd   :  { %v113_v48 = vpop.f32.mrf.mxu0  ;;  %v133_v50 = vpop.f32.mrf.mxu1 }
  0xfe   :  { %v114_v49 = vadd.f32 %v159_v47, %v113_v48 }
 0x100   :  { %v134_v51 = vadd.f32 %v133_v50, %v114_v49 }
 0x102   :  { %136 = vmax.xlane.f32.xlu0 %v134_v51 }
 0x175   :  { %v137_v52 = vpop.xlane.xlu0 %136 }
 0x176   :  { %v138_v53 = vsub.f32 %v134_v51, %v137_v52 }
 0x178   :  { %v139_v54 = vmul.f32 1.442695, %v138_v53 }
 0x17a   :  { %160 = vpow2.f32 %v139_v54 }
 0x180   :  { %v161_v55 = vpop.eup %160 }
 0x181   :  { %141 = vadd.xlane.f32.xlu1 %v161_v55 }
 0x1f4   :  { %v142_v56 = vpop.xlane.xlu1 %141 }
 0x1f5   :  { %162 = vrcp.f32 %v142_v56 }
 0x1fb   :  { %v163_v57 = vpop.eup %162 }
 0x1fc   :  { %v144_v58 = vmul.f32 %v163_v57, %v142_v56 }
 0x1fe   :  { %v145_v59 = vsub.f32 2.0, %v144_v58 }
 0x200   :  { %v146_v60 = vmul.f32 %v163_v57, %v145_v59 }
 0x202   :  { %v147_v61 = vmul.f32 %v161_v55, %v146_v60 }
 0x204   :  { %148 = vst [vmem:[%s247_s5] sm:$0xff] %v147_v61 }
 0x205   :  { %153 = vsyncpa [#allocation3], 1 }

</bundles_post_ra>
